<compile_context>
chip_gen: v6e
topology: v6e:2x2x1
jax: 0.10.0
libtpu: 0.0.40
codegen_flags: <defaults>
</compile_context>

<pallas_src>
import functools

import jax
import jax.numpy as jnp
from jax.experimental import pallas as pl
from jax.experimental.pallas import tpu as pltpu

MATMUL_DTYPE = jnp.bfloat16   # MXU operand dtype (f32 accumulation)
LN_EPS = 1e-5


# ---------------------------------------------------------------------------
# Small helpers
# ---------------------------------------------------------------------------

def _pick_tile_m(m, cap=256):
    """Row tile for M-tiled kernels, capped so live f32 intermediates fit."""
    for t in (256, 128):
        if t <= cap and m % t == 0:
            return t
    return m  # tiny M (demo shapes): single full-extent block


def _parallel(n_axes=1):
    return pltpu.CompilerParams(dimension_semantics=("parallel",) * n_axes)


def _layer_norm(y_f32, g, b):
    mu = jnp.mean(y_f32, axis=-1, keepdims=True)
    var = jnp.mean((y_f32 - mu) * (y_f32 - mu), axis=-1, keepdims=True)
    return (y_f32 - mu) * jax.lax.rsqrt(var + LN_EPS) * g + b


def _mha(q, k, v, mask, w_ref, num_heads, scale):
    """q:(Sq,D) k,v:(Sk,D) f32; mask:(Sq,Sk).  Writes per-head probabilities
    into w_ref[0,h] (exact softmax) and returns the (Sq,D) f32 context.
    Fully-masked rows produce NaN (masked_fill(-inf) semantics)."""
    D = q.shape[-1]
    Dh = D // num_heads
    keep = mask != 0                       # hoisted: single compare, not H
    neg_inf = jnp.float32(-jnp.inf)
    kb = k.astype(MATMUL_DTYPE)
    vb = v.astype(MATMUL_DTYPE)
    outs = []
    for h in range(num_heads):             # static loop; head = lane slice
        sl = slice(h * Dh, (h + 1) * Dh)
        qh = (q[:, sl] * scale).astype(MATMUL_DTYPE)
        s = jax.lax.dot_general(qh, kb[:, sl], (((1,), (1,)), ((), ())),
                                preferred_element_type=jnp.float32)
        s = jnp.where(keep, s, neg_inf)
        m = jnp.max(s, axis=-1, keepdims=True)
        e = jnp.exp(s - m)
        p = e / jnp.sum(e, axis=-1, keepdims=True)      # exact divide
        w_ref[0, h] = p.astype(w_ref.dtype)
        outs.append(jnp.dot(p.astype(MATMUL_DTYPE), vb[:, sl],
                            preferred_element_type=jnp.float32))
    return jnp.concatenate(outs, axis=-1)  # (Sq, D) f32


# ---------------------------------------------------------------------------
# Fused self-attention block:  LN( x + Wo·MHA(QKV(x)) )
# ---------------------------------------------------------------------------

def _self_block_kernel(x_ref, m_ref, wqkv_ref, bqkv_ref, wo_ref, bo_ref,
                       g_ref, bt_ref, o_ref, w_ref, *, num_heads, scale,
                       embed_dim):
    D = embed_dim
    x = x_ref[0]                                          # (S, D)
    qkv = jnp.dot(x.astype(MATMUL_DTYPE), wqkv_ref[...],
                  preferred_element_type=jnp.float32) + bqkv_ref[...]
    ctx = _mha(qkv[:, :D], qkv[:, D:2 * D], qkv[:, 2 * D:], m_ref[0],
               w_ref, num_heads, scale)
    y = jnp.dot(ctx.astype(MATMUL_DTYPE), wo_ref[...],
                preferred_element_type=jnp.float32)
    y = y + bo_ref[...] + x.astype(jnp.float32)
    o_ref[0] = _layer_norm(y, g_ref[...], bt_ref[...]).astype(o_ref.dtype)


def self_attention_block(x, mask, p, num_heads):
    B, S, D = x.shape
    H = num_heads
    scale = 1.0 / ((D // H) ** 0.5)
    kernel = functools.partial(_self_block_kernel, num_heads=H, scale=scale,
                               embed_dim=D)
    flops = B * (2 * S * D * 3 * D + 4 * S * S * D + 2 * S * D * D)
    bytes_acc = 4 * (2 * B * S * D + B * S * S + B * H * S * S + 8 * D) \
        + 2 * (4 * D * D)
    return pl.pallas_call(
        kernel,
        out_shape=(jax.ShapeDtypeStruct((B, S, D), x.dtype),
                   jax.ShapeDtypeStruct((B, H, S, S), jnp.float32)),
        grid=(B,),
        in_specs=[pl.BlockSpec((1, S, D), lambda b: (b, 0, 0)),
                  pl.BlockSpec((1, S, S), lambda b: (b, 0, 0)),
                  pl.BlockSpec((D, 3 * D), lambda b: (0, 0)),
                  pl.BlockSpec((1, 3 * D), lambda b: (0, 0)),
                  pl.BlockSpec((D, D), lambda b: (0, 0)),
                  pl.BlockSpec((1, D), lambda b: (0, 0)),
                  pl.BlockSpec((1, D), lambda b: (0, 0)),
                  pl.BlockSpec((1, D), lambda b: (0, 0))],
        out_specs=(pl.BlockSpec((1, S, D), lambda b: (b, 0, 0)),
                   pl.BlockSpec((1, H, S, S), lambda b: (b, 0, 0, 0))),
        compiler_params=_parallel(1),
        cost_estimate=pl.CostEstimate(flops=flops,
                                      transcendentals=B * H * S * S,
                                      bytes_accessed=bytes_acc),
    )(x, mask, p["self_wqkv"], p["self_bqkv"], p["self_wo"], p["self_bo"],
      p["ln_g"], p["ln_b"])


# ---------------------------------------------------------------------------
# Fused cross-attention block:  LN( x + Wo·MHA(Q(x), KV(enc)) )
# ---------------------------------------------------------------------------

def _cross_block_kernel(x_ref, enc_ref, m_ref, wq_ref, bq_ref, wkv_ref,
                        bkv_ref, wo_ref, bo_ref, g_ref, bt_ref, o_ref, w_ref,
                        *, num_heads, scale, embed_dim):
    D = embed_dim
    x = x_ref[0]                                          # (Sq, D)
    q = jnp.dot(x.astype(MATMUL_DTYPE), wq_ref[...],
                preferred_element_type=jnp.float32) + bq_ref[...]
    kv = jnp.dot(enc_ref[0].astype(MATMUL_DTYPE), wkv_ref[...],
                 preferred_element_type=jnp.float32) + bkv_ref[...]
    ctx = _mha(q, kv[:, :D], kv[:, D:], m_ref[0], w_ref, num_heads, scale)
    y = jnp.dot(ctx.astype(MATMUL_DTYPE), wo_ref[...],
                preferred_element_type=jnp.float32)
    y = y + bo_ref[...] + x.astype(jnp.float32)
    o_ref[0] = _layer_norm(y, g_ref[...], bt_ref[...]).astype(o_ref.dtype)


def cross_attention_block(x, enc, mask, p, num_heads):
    B, Sq, D = x.shape
    Sk = enc.shape[1]
    H = num_heads
    scale = 1.0 / ((D // H) ** 0.5)
    kernel = functools.partial(_cross_block_kernel, num_heads=H, scale=scale,
                               embed_dim=D)
    flops = B * (2 * Sq * D * D + 2 * Sk * D * 2 * D + 4 * Sq * Sk * D
                 + 2 * Sq * D * D)
    bytes_acc = 4 * (2 * B * Sq * D + B * Sk * D + B * Sq * Sk
                     + B * H * Sq * Sk + 8 * D) + 2 * (4 * D * D)
    return pl.pallas_call(
        kernel,
        out_shape=(jax.ShapeDtypeStruct((B, Sq, D), x.dtype),
                   jax.ShapeDtypeStruct((B, H, Sq, Sk), jnp.float32)),
        grid=(B,),
        in_specs=[pl.BlockSpec((1, Sq, D), lambda b: (b, 0, 0)),
                  pl.BlockSpec((1, Sk, D), lambda b: (b, 0, 0)),
                  pl.BlockSpec((1, Sq, Sk), lambda b: (b, 0, 0)),
                  pl.BlockSpec((D, D), lambda b: (0, 0)),
                  pl.BlockSpec((1, D), lambda b: (0, 0)),
                  pl.BlockSpec((D, 2 * D), lambda b: (0, 0)),
                  pl.BlockSpec((1, 2 * D), lambda b: (0, 0)),
                  pl.BlockSpec((D, D), lambda b: (0, 0)),
                  pl.BlockSpec((1, D), lambda b: (0, 0)),
                  pl.BlockSpec((1, D), lambda b: (0, 0)),
                  pl.BlockSpec((1, D), lambda b: (0, 0))],
        out_specs=(pl.BlockSpec((1, Sq, D), lambda b: (b, 0, 0)),
                   pl.BlockSpec((1, H, Sq, Sk), lambda b: (b, 0, 0, 0))),
        compiler_params=_parallel(1),
        cost_estimate=pl.CostEstimate(flops=flops,
                                      transcendentals=B * H * Sq * Sk,
                                      bytes_accessed=bytes_acc),
    )(x, enc, mask, p["cross_wq"], p["cross_bq"], p["cross_wkv"],
      p["cross_bkv"], p["cross_wo"], p["cross_bo"], p["ln_g"], p["ln_b"])


# ---------------------------------------------------------------------------
# Fused FFN block:  LN( x + W2·relu(W1·x + b1) + b2 )      (dropout = identity)
# ---------------------------------------------------------------------------

def _ffn_block_kernel(x_ref, w1_ref, b1_ref, w2_ref, b2_ref, g_ref, bt_ref,
                      o_ref):
    x = x_ref[...]
    h = jnp.dot(x.astype(MATMUL_DTYPE), w1_ref[...],
                preferred_element_type=jnp.float32)
    h = jnp.maximum(h + b1_ref[...], 0.0)        # f32 until the dot input cast
    y = jnp.dot(h.astype(MATMUL_DTYPE), w2_ref[...],
                preferred_element_type=jnp.float32)
    y = y + b2_ref[...] + x.astype(jnp.float32)
    o_ref[...] = _layer_norm(y, g_ref[...], bt_ref[...]).astype(o_ref.dtype)


def ffn_block(x2d, p):
    M, D = x2d.shape
    Dff = p["ff_w1"].shape[1]
    tm = _pick_tile_m(M, cap=256)                # cap keeps (tm,Dff) in budget
    flops = 4 * M * D * Dff
    bytes_acc = 4 * (2 * M * D + Dff + 3 * D) + 2 * (2 * D * Dff)
    return pl.pallas_call(
        _ffn_block_kernel,
        out_shape=jax.ShapeDtypeStruct((M, D), x2d.dtype),
        grid=(M // tm,),
        in_specs=[pl.BlockSpec((tm, D), lambda i: (i, 0)),
                  pl.BlockSpec((D, Dff), lambda i: (0, 0)),
                  pl.BlockSpec((1, Dff), lambda i: (0, 0)),
                  pl.BlockSpec((Dff, D), lambda i: (0, 0)),
                  pl.BlockSpec((1, D), lambda i: (0, 0)),
                  pl.BlockSpec((1, D), lambda i: (0, 0)),
                  pl.BlockSpec((1, D), lambda i: (0, 0))],
        out_specs=pl.BlockSpec((tm, D), lambda i: (i, 0)),
        compiler_params=_parallel(1),
        cost_estimate=pl.CostEstimate(flops=flops, transcendentals=0,
                                      bytes_accessed=bytes_acc),
    )(x2d, p["ff_w1"], p["ff_b1"], p["ff_w2"], p["ff_b2"], p["ln_g"],
      p["ln_b"])


# ---------------------------------------------------------------------------
# Model glue
# ---------------------------------------------------------------------------

def decoder_block(p, input_seq, encoder_output, cross_mask, tgt_mask,
                  num_heads):
    B, S, D = input_seq.shape
    out, self_w = self_attention_block(input_seq, tgt_mask, p, num_heads)
    out, cross_w = cross_attention_block(out, encoder_output, cross_mask, p,
                                         num_heads)
    out = ffn_block(out.reshape(B * S, D), p).reshape(B, S, D)
    return out, self_w, cross_w


def transformer_decoder(params, input_seq, encoder_output, cross_mask,
                        tgt_mask, num_heads):
    output = input_seq
    self_weights, cross_weights = [], []
    for p in params:
        output, sw, cw = decoder_block(p, output, encoder_output,
                                       cross_mask, tgt_mask, num_heads)
        self_weights.append(sw)      # (B, H, Sq, Sk) per layer
        cross_weights.append(cw)
    return output, self_weights, cross_weights


# ---------------------------------------------------------------------------
# Deterministic parameter init (fused QKV / KV layouts; matmul weights in bf16)
# ---------------------------------------------------------------------------

def init_params(key, embed_dim, feed_forward_hidden_dim, num_layers):
    D, Dff = embed_dim, feed_forward_hidden_dim
    params = []
    for _ in range(num_layers):
        keys = jax.random.split(key, 21)
        key = keys[-1]

        def w(k, shape, scale=0.05):          # MXU operand weights: bf16
            return (scale * jax.random.normal(k, shape)).astype(MATMUL_DTYPE)

        def b(k, shape, scale=0.02):          # biases / LN params: f32
            return (scale * jax.random.normal(k, shape)).astype(jnp.float32)

        params.append({
            "self_wqkv": jnp.concatenate(
                [w(keys[0], (D, D)), w(keys[1], (D, D)), w(keys[2], (D, D))],
                axis=1),
            "self_bqkv": b(keys[3], (1, 3 * D)),
            "self_wo": w(keys[4], (D, D)),
            "self_bo": b(keys[5], (1, D)),
            "cross_wq": w(keys[6], (D, D)),
            "cross_bq": b(keys[7], (1, D)),
            "cross_wkv": jnp.concatenate(
                [w(keys[8], (D, D)), w(keys[9], (D, D))], axis=1),
            "cross_bkv": b(keys[10], (1, 2 * D)),
            "cross_wo": w(keys[11], (D, D)),
            "cross_bo": b(keys[12], (1, D)),
            "ff_w1": w(keys[13], (D, Dff)),
            "ff_b1": b(keys[14], (1, Dff)),
            "ff_w2": w(keys[15], (Dff, D)),
            "ff_b2": b(keys[16], (1, D)),
            # single shared LayerNorm per block (matches reference module)
            "ln_g": jnp.ones((1, D), jnp.float32),
            "ln_b": jnp.zeros((1, D), jnp.float32),
        })
    return params


# ---------------------------------------------------------------------------
# Pure-JAX reference (f32 math) for numerical sanity check
# ---------------------------------------------------------------------------

def _reference_decoder(params, input_seq, encoder_output, cross_mask, tgt_mask,
                       num_heads):
    D = input_seq.shape[-1]

    def ln(x, g, b):
        mu = jnp.mean(x, -1, keepdims=True)
        var = jnp.mean((x - mu) ** 2, -1, keepdims=True)
        return (x - mu) * jax.lax.rsqrt(var + LN_EPS) * g + b

    def mha(q_in, k_in, v_in, mask, wq, bq, wk, bk, wv, bv, wo, bo):
        B, Sq, _ = q_in.shape
        Sk = k_in.shape[1]
        H = num_heads
        Dh = D // H
        q = (q_in @ wq + bq).reshape(B, Sq, H, Dh).transpose(0, 2, 1, 3)
        k = (k_in @ wk + bk).reshape(B, Sk, H, Dh).transpose(0, 2, 1, 3)
        v = (v_in @ wv + bv).reshape(B, Sk, H, Dh).transpose(0, 2, 1, 3)
        s = jnp.einsum("bhqd,bhkd->bhqk", q, k) / (Dh ** 0.5)
        s = jnp.where(mask[:, None] != 0, s, -jnp.inf)
        p = jax.nn.softmax(s, axis=-1)
        o = jnp.einsum("bhqk,bhkd->bhqd", p, v).transpose(0, 2, 1, 3)
        return o.reshape(B, Sq, D) @ wo + bo, p

    out = input_seq
    self_ws, cross_ws = [], []
    for p_bf in params:
        p = {k: v.astype(jnp.float32) for k, v in p_bf.items()}
        wq, wk, wv = (p["self_wqkv"][:, :D], p["self_wqkv"][:, D:2 * D],
                      p["self_wqkv"][:, 2 * D:])
        bq, bk, bv = (p["self_bqkv"][:, :D], p["self_bqkv"][:, D:2 * D],
                      p["self_bqkv"][:, 2 * D:])
        a, sw = mha(out, out, out, tgt_mask, wq, bq, wk, bk, wv, bv,
                    p["self_wo"], p["self_bo"])
        out = ln(a + out, p["ln_g"], p["ln_b"])
        wk2, wv2 = p["cross_wkv"][:, :D], p["cross_wkv"][:, D:]
        bk2, bv2 = p["cross_bkv"][:, :D], p["cross_bkv"][:, D:]
        a, cw = mha(out, encoder_output, encoder_output, cross_mask,
                    p["cross_wq"], p["cross_bq"], wk2, bk2, wv2, bv2,
                    p["cross_wo"], p["cross_bo"])
        out = ln(a + out, p["ln_g"], p["ln_b"])
        h = jnp.maximum(out @ p["ff_w1"] + p["ff_b1"], 0.0)
        f = h @ p["ff_w2"] + p["ff_b2"]
        out = ln(f + out, p["ln_g"], p["ln_b"])
        self_ws.append(sw)
        cross_ws.append(cw)
    return out, self_ws, cross_ws


# ---------------------------------------------------------------------------
# Demo
# ---------------------------------------------------------------------------

if __name__ == "__main__":
    B, S_tgt, S_src = 2, 8, 8
    embed_dim, num_heads, ff_hidden, num_layers = 32, 4, 64, 2

    root = jax.random.PRNGKey(0)
    k_in, k_enc, k_par = jax.random.split(root, 3)

    input_seq = jax.random.normal(k_in, (B, S_tgt, embed_dim), jnp.float32)
    encoder_output = jax.random.normal(k_enc, (B, S_src, embed_dim),
                                       jnp.float32)

    # masks: nonzero = attend. tgt mask is causal, cross mask is all-ones.
    causal = jnp.tril(jnp.ones((S_tgt, S_tgt), jnp.float32))
    tgt_mask = jnp.broadcast_to(causal, (B, S_tgt, S_tgt))
    cross_mask = jnp.ones((B, S_tgt, S_src), jnp.float32)

    params = init_params(k_par, embed_dim, ff_hidden, num_layers)

    out, self_ws, cross_ws = transformer_decoder(
        params, input_seq, encoder_output, cross_mask, tgt_mask, num_heads)

    jax.block_until_ready(out)
    for w_ in self_ws + cross_ws:
        jax.block_until_ready(w_)

    assert out.shape == (B, S_tgt, embed_dim)
    assert len(self_ws) == num_layers and len(cross_ws) == num_layers
    assert self_ws[0].shape == (B, num_heads, S_tgt, S_tgt)
    assert cross_ws[0].shape == (B, num_heads, S_tgt, S_src)

    # numerical sanity check vs. pure-JAX f32 reference (tolerance covers the
    # bf16 MXU operands used in the kernels).
    ref_out, ref_sws, ref_cws = _reference_decoder(
        params, input_seq, encoder_output, cross_mask, tgt_mask, num_heads)
    assert float(jnp.max(jnp.abs(out - ref_out))) < 5e-2
    assert float(jnp.max(jnp.abs(self_ws[0] - ref_sws[0]))) < 5e-2
    assert float(jnp.max(jnp.abs(cross_ws[-1] - ref_cws[-1]))) < 5e-2
    # returned attention probabilities must row-sum to 1 (exact softmax divide)
    assert float(jnp.max(jnp.abs(jnp.sum(self_ws[0], -1) - 1.0))) < 1e-4

    print("KERNEL_OK")
</pallas_src>

<mosaic_0001>
module attributes {stable_mosaic.version = 11 : i64} {
  func.func @_self_block_kernel(%arg0: i32, %arg1: memref<1x8x32xf32, #tpu.memory_space<vmem>>, %arg2: memref<1x8x8xf32, #tpu.memory_space<vmem>>, %arg3: memref<32x96xbf16, #tpu.memory_space<vmem>>, %arg4: memref<1x96xf32, #tpu.memory_space<vmem>>, %arg5: memref<32x32xbf16, #tpu.memory_space<vmem>>, %arg6: memref<1x32xf32, #tpu.memory_space<vmem>>, %arg7: memref<1x32xf32, #tpu.memory_space<vmem>>, %arg8: memref<1x32xf32, #tpu.memory_space<vmem>>, %arg9: memref<1x8x32xf32, #tpu.memory_space<vmem>>, %arg10: memref<1x4x8x8xf32, #tpu.memory_space<vmem>>) attributes {dimension_semantics = [#tpu.dimension_semantics<parallel>], iteration_bounds = array<i64: 2>, scalar_prefetch = 0 : i64, scratch_operands = 0 : i64, tpu.core_type = #tpu.core_type<tc>, window_params = [{transform_indices = @transform_0, window_bounds = array<i64: 1, 8, 32>}, {transform_indices = @transform_1, window_bounds = array<i64: 1, 8, 8>}, {pipeline_mode = #tpu.pipeline_mode<synchronous>, transform_indices = @transform_2, window_bounds = array<i64: 32, 96>}, {pipeline_mode = #tpu.pipeline_mode<synchronous>, transform_indices = @transform_3, window_bounds = array<i64: 1, 96>}, {pipeline_mode = #tpu.pipeline_mode<synchronous>, transform_indices = @transform_4, window_bounds = array<i64: 32, 32>}, {pipeline_mode = #tpu.pipeline_mode<synchronous>, transform_indices = @transform_5, window_bounds = array<i64: 1, 32>}, {pipeline_mode = #tpu.pipeline_mode<synchronous>, transform_indices = @transform_6, window_bounds = array<i64: 1, 32>}, {pipeline_mode = #tpu.pipeline_mode<synchronous>, transform_indices = @transform_7, window_bounds = array<i64: 1, 32>}, {transform_indices = @transform_8, window_bounds = array<i64: 1, 8, 32>}, {transform_indices = @transform_9, window_bounds = array<i64: 1, 4, 8, 8>}]} {
    %c0 = arith.constant 0 : index
    %c0_0 = arith.constant 0 : index
    %c0_1 = arith.constant 0 : index
    %0 = vector.load %arg1[%c0, %c0_0, %c0_1] : memref<1x8x32xf32, #tpu.memory_space<vmem>>, vector<1x8x32xf32>
    %1 = vector.shape_cast %0 : vector<1x8x32xf32> to vector<8x32xf32>
    %2 = arith.truncf %1 : vector<8x32xf32> to vector<8x32xbf16>
    %c0_2 = arith.constant 0 : index
    %c0_3 = arith.constant 0 : index
    %3 = vector.load %arg3[%c0_2, %c0_3] : memref<32x96xbf16, #tpu.memory_space<vmem>>, vector<32x96xbf16>
    %cst = arith.constant dense<0.000000e+00> : vector<8x96xf32>
    %4 = tpu.matmul %2, %3, %cst {dimension_numbers = #tpu.dot_dimension_numbers<[1], [0], [0], [1], [0, 0, 1, 1], [], []>} : vector<8x32xbf16>, vector<32x96xbf16>, vector<8x96xf32> -> vector<8x96xf32>
    %c0_4 = arith.constant 0 : index
    %c0_5 = arith.constant 0 : index
    %5 = vector.load %arg4[%c0_4, %c0_5] : memref<1x96xf32, #tpu.memory_space<vmem>>, vector<1x96xf32>
    %6 = vector.broadcast %5 : vector<1x96xf32> to vector<8x96xf32>
    %7 = arith.addf %4, %6 : vector<8x96xf32>
    %8 = vector.extract_strided_slice %7 {offsets = [0, 0], sizes = [8, 32], strides = [1, 1]} : vector<8x96xf32> to vector<8x32xf32>
    %9 = vector.extract_strided_slice %7 {offsets = [0, 32], sizes = [8, 32], strides = [1, 1]} : vector<8x96xf32> to vector<8x32xf32>
    %10 = vector.extract_strided_slice %7 {offsets = [0, 64], sizes = [8, 32], strides = [1, 1]} : vector<8x96xf32> to vector<8x32xf32>
    %c0_6 = arith.constant 0 : index
    %c0_7 = arith.constant 0 : index
    %c0_8 = arith.constant 0 : index
    %11 = vector.load %arg2[%c0_6, %c0_7, %c0_8] : memref<1x8x8xf32, #tpu.memory_space<vmem>>, vector<1x8x8xf32>
    %12 = vector.shape_cast %11 : vector<1x8x8xf32> to vector<8x8xf32>
    %cst_9 = arith.constant 0.000000e+00 : f32
    %13 = vector.broadcast %cst_9 : f32 to vector<8x8xf32>
    %14 = arith.cmpf one, %12, %13 : vector<8x8xf32>
    %15 = arith.truncf %9 : vector<8x32xf32> to vector<8x32xbf16>
    %16 = arith.truncf %10 : vector<8x32xf32> to vector<8x32xbf16>
    %17 = vector.extract_strided_slice %8 {offsets = [0, 0], sizes = [8, 8], strides = [1, 1]} : vector<8x32xf32> to vector<8x8xf32>
    %cst_10 = arith.constant 0.353553385 : f32
    %18 = vector.broadcast %cst_10 : f32 to vector<8x8xf32>
    %19 = arith.mulf %17, %18 : vector<8x8xf32>
    %20 = arith.truncf %19 : vector<8x8xf32> to vector<8x8xbf16>
    %21 = vector.extract_strided_slice %15 {offsets = [0, 0], sizes = [8, 8], strides = [1, 1]} : vector<8x32xbf16> to vector<8x8xbf16>
    %cst_11 = arith.constant dense<0.000000e+00> : vector<8x8xf32>
    %22 = tpu.matmul %20, %21, %cst_11 {dimension_numbers = #tpu.dot_dimension_numbers<[1], [1], [0], [0], [0, 0, 1, 0], [], []>} : vector<8x8xbf16>, vector<8x8xbf16>, vector<8x8xf32> -> vector<8x8xf32>
    %cst_12 = arith.constant 0xFF800000 : f32
    %23 = vector.broadcast %cst_12 : f32 to vector<8x8xf32>
    %24 = arith.select %14, %22, %23 : vector<8x8xi1>, vector<8x8xf32>
    %cst_13 = arith.constant dense<0xFF800000> : vector<8xf32>
    %25 = vector.multi_reduction <maximumf>, %24, %cst_13 [1] : vector<8x8xf32> to vector<8xf32>
    %26 = vector.shape_cast %25 : vector<8xf32> to vector<8x1xf32>
    %27 = vector.broadcast %26 : vector<8x1xf32> to vector<8x8xf32>
    %28 = arith.subf %24, %27 : vector<8x8xf32>
    %29 = math.exp %28 : vector<8x8xf32>
    %cst_14 = arith.constant dense<0.000000e+00> : vector<8xf32>
    %30 = vector.multi_reduction <add>, %29, %cst_14 [1] : vector<8x8xf32> to vector<8xf32>
    %31 = vector.shape_cast %30 : vector<8xf32> to vector<8x1xf32>
    %32 = vector.broadcast %31 : vector<8x1xf32> to vector<8x8xf32>
    %33 = arith.divf %29, %32 : vector<8x8xf32>
    %c0_15 = arith.constant 0 : index
    %c0_16 = arith.constant 0 : index
    %c0_17 = arith.constant 0 : index
    %c0_18 = arith.constant 0 : index
    %34 = vector.load %arg10[%c0_15, %c0_16, %c0_17, %c0_18] : memref<1x4x8x8xf32, #tpu.memory_space<vmem>>, vector<1x1x8x8xf32>
    %35 = vector.shape_cast %34 : vector<1x1x8x8xf32> to vector<8x8xf32>
    %36 = vector.shape_cast %33 : vector<8x8xf32> to vector<1x1x8x8xf32>
    tpu.vector_store %arg10[%c0_15, %c0_16, %c0_17, %c0_18], %36 {strides = array<i32>} : memref<1x4x8x8xf32, #tpu.memory_space<vmem>>, vector<1x1x8x8xf32>,
    %37 = arith.truncf %33 : vector<8x8xf32> to vector<8x8xbf16>
    %38 = vector.extract_strided_slice %16 {offsets = [0, 0], sizes = [8, 8], strides = [1, 1]} : vector<8x32xbf16> to vector<8x8xbf16>
    %cst_19 = arith.constant dense<0.000000e+00> : vector<8x8xf32>
    %39 = tpu.matmul %37, %38, %cst_19 {dimension_numbers = #tpu.dot_dimension_numbers<[1], [0], [0], [1], [0, 0, 1, 1], [], []>} : vector<8x8xbf16>, vector<8x8xbf16>, vector<8x8xf32> -> vector<8x8xf32>
    %40 = vector.extract_strided_slice %8 {offsets = [0, 8], sizes = [8, 8], strides = [1, 1]} : vector<8x32xf32> to vector<8x8xf32>
    %cst_20 = arith.constant 0.353553385 : f32
    %41 = vector.broadcast %cst_20 : f32 to vector<8x8xf32>
    %42 = arith.mulf %40, %41 : vector<8x8xf32>
    %43 = arith.truncf %42 : vector<8x8xf32> to vector<8x8xbf16>
    %44 = vector.extract_strided_slice %15 {offsets = [0, 8], sizes = [8, 8], strides = [1, 1]} : vector<8x32xbf16> to vector<8x8xbf16>
    %cst_21 = arith.constant dense<0.000000e+00> : vector<8x8xf32>
    %45 = tpu.matmul %43, %44, %cst_21 {dimension_numbers = #tpu.dot_dimension_numbers<[1], [1], [0], [0], [0, 0, 1, 0], [], []>} : vector<8x8xbf16>, vector<8x8xbf16>, vector<8x8xf32> -> vector<8x8xf32>
    %cst_22 = arith.constant 0xFF800000 : f32
    %46 = vector.broadcast %cst_22 : f32 to vector<8x8xf32>
    %47 = arith.select %14, %45, %46 : vector<8x8xi1>, vector<8x8xf32>
    %cst_23 = arith.constant dense<0xFF800000> : vector<8xf32>
    %48 = vector.multi_reduction <maximumf>, %47, %cst_23 [1] : vector<8x8xf32> to vector<8xf32>
    %49 = vector.shape_cast %48 : vector<8xf32> to vector<8x1xf32>
    %50 = vector.broadcast %49 : vector<8x1xf32> to vector<8x8xf32>
    %51 = arith.subf %47, %50 : vector<8x8xf32>
    %52 = math.exp %51 : vector<8x8xf32>
    %cst_24 = arith.constant dense<0.000000e+00> : vector<8xf32>
    %53 = vector.multi_reduction <add>, %52, %cst_24 [1] : vector<8x8xf32> to vector<8xf32>
    %54 = vector.shape_cast %53 : vector<8xf32> to vector<8x1xf32>
    %55 = vector.broadcast %54 : vector<8x1xf32> to vector<8x8xf32>
    %56 = arith.divf %52, %55 : vector<8x8xf32>
    %c0_25 = arith.constant 0 : index
    %c1 = arith.constant 1 : index
    %c0_26 = arith.constant 0 : index
    %c0_27 = arith.constant 0 : index
    %57 = vector.load %arg10[%c0_25, %c1, %c0_26, %c0_27] : memref<1x4x8x8xf32, #tpu.memory_space<vmem>>, vector<1x1x8x8xf32>
    %58 = vector.shape_cast %57 : vector<1x1x8x8xf32> to vector<8x8xf32>
    %59 = vector.shape_cast %56 : vector<8x8xf32> to vector<1x1x8x8xf32>
    tpu.vector_store %arg10[%c0_25, %c1, %c0_26, %c0_27], %59 {strides = array<i32>} : memref<1x4x8x8xf32, #tpu.memory_space<vmem>>, vector<1x1x8x8xf32>,
    %60 = arith.truncf %56 : vector<8x8xf32> to vector<8x8xbf16>
    %61 = vector.extract_strided_slice %16 {offsets = [0, 8], sizes = [8, 8], strides = [1, 1]} : vector<8x32xbf16> to vector<8x8xbf16>
    %cst_28 = arith.constant dense<0.000000e+00> : vector<8x8xf32>
    %62 = tpu.matmul %60, %61, %cst_28 {dimension_numbers = #tpu.dot_dimension_numbers<[1], [0], [0], [1], [0, 0, 1, 1], [], []>} : vector<8x8xbf16>, vector<8x8xbf16>, vector<8x8xf32> -> vector<8x8xf32>
    %63 = vector.extract_strided_slice %8 {offsets = [0, 16], sizes = [8, 8], strides = [1, 1]} : vector<8x32xf32> to vector<8x8xf32>
    %cst_29 = arith.constant 0.353553385 : f32
    %64 = vector.broadcast %cst_29 : f32 to vector<8x8xf32>
    %65 = arith.mulf %63, %64 : vector<8x8xf32>
    %66 = arith.truncf %65 : vector<8x8xf32> to vector<8x8xbf16>
    %67 = vector.extract_strided_slice %15 {offsets = [0, 16], sizes = [8, 8], strides = [1, 1]} : vector<8x32xbf16> to vector<8x8xbf16>
    %cst_30 = arith.constant dense<0.000000e+00> : vector<8x8xf32>
    %68 = tpu.matmul %66, %67, %cst_30 {dimension_numbers = #tpu.dot_dimension_numbers<[1], [1], [0], [0], [0, 0, 1, 0], [], []>} : vector<8x8xbf16>, vector<8x8xbf16>, vector<8x8xf32> -> vector<8x8xf32>
    %cst_31 = arith.constant 0xFF800000 : f32
    %69 = vector.broadcast %cst_31 : f32 to vector<8x8xf32>
    %70 = arith.select %14, %68, %69 : vector<8x8xi1>, vector<8x8xf32>
    %cst_32 = arith.constant dense<0xFF800000> : vector<8xf32>
    %71 = vector.multi_reduction <maximumf>, %70, %cst_32 [1] : vector<8x8xf32> to vector<8xf32>
    %72 = vector.shape_cast %71 : vector<8xf32> to vector<8x1xf32>
    %73 = vector.broadcast %72 : vector<8x1xf32> to vector<8x8xf32>
    %74 = arith.subf %70, %73 : vector<8x8xf32>
    %75 = math.exp %74 : vector<8x8xf32>
    %cst_33 = arith.constant dense<0.000000e+00> : vector<8xf32>
    %76 = vector.multi_reduction <add>, %75, %cst_33 [1] : vector<8x8xf32> to vector<8xf32>
    %77 = vector.shape_cast %76 : vector<8xf32> to vector<8x1xf32>
    %78 = vector.broadcast %77 : vector<8x1xf32> to vector<8x8xf32>
    %79 = arith.divf %75, %78 : vector<8x8xf32>
    %c0_34 = arith.constant 0 : index
    %c2 = arith.constant 2 : index
    %c0_35 = arith.constant 0 : index
    %c0_36 = arith.constant 0 : index
    %80 = vector.load %arg10[%c0_34, %c2, %c0_35, %c0_36] : memref<1x4x8x8xf32, #tpu.memory_space<vmem>>, vector<1x1x8x8xf32>
    %81 = vector.shape_cast %80 : vector<1x1x8x8xf32> to vector<8x8xf32>
    %82 = vector.shape_cast %79 : vector<8x8xf32> to vector<1x1x8x8xf32>
    tpu.vector_store %arg10[%c0_34, %c2, %c0_35, %c0_36], %82 {strides = array<i32>} : memref<1x4x8x8xf32, #tpu.memory_space<vmem>>, vector<1x1x8x8xf32>,
    %83 = arith.truncf %79 : vector<8x8xf32> to vector<8x8xbf16>
    %84 = vector.extract_strided_slice %16 {offsets = [0, 16], sizes = [8, 8], strides = [1, 1]} : vector<8x32xbf16> to vector<8x8xbf16>
    %cst_37 = arith.constant dense<0.000000e+00> : vector<8x8xf32>
    %85 = tpu.matmul %83, %84, %cst_37 {dimension_numbers = #tpu.dot_dimension_numbers<[1], [0], [0], [1], [0, 0, 1, 1], [], []>} : vector<8x8xbf16>, vector<8x8xbf16>, vector<8x8xf32> -> vector<8x8xf32>
    %86 = vector.extract_strided_slice %8 {offsets = [0, 24], sizes = [8, 8], strides = [1, 1]} : vector<8x32xf32> to vector<8x8xf32>
    %cst_38 = arith.constant 0.353553385 : f32
    %87 = vector.broadcast %cst_38 : f32 to vector<8x8xf32>
    %88 = arith.mulf %86, %87 : vector<8x8xf32>
    %89 = arith.truncf %88 : vector<8x8xf32> to vector<8x8xbf16>
    %90 = vector.extract_strided_slice %15 {offsets = [0, 24], sizes = [8, 8], strides = [1, 1]} : vector<8x32xbf16> to vector<8x8xbf16>
    %cst_39 = arith.constant dense<0.000000e+00> : vector<8x8xf32>
    %91 = tpu.matmul %89, %90, %cst_39 {dimension_numbers = #tpu.dot_dimension_numbers<[1], [1], [0], [0], [0, 0, 1, 0], [], []>} : vector<8x8xbf16>, vector<8x8xbf16>, vector<8x8xf32> -> vector<8x8xf32>
    %cst_40 = arith.constant 0xFF800000 : f32
    %92 = vector.broadcast %cst_40 : f32 to vector<8x8xf32>
    %93 = arith.select %14, %91, %92 : vector<8x8xi1>, vector<8x8xf32>
    %cst_41 = arith.constant dense<0xFF800000> : vector<8xf32>
    %94 = vector.multi_reduction <maximumf>, %93, %cst_41 [1] : vector<8x8xf32> to vector<8xf32>
    %95 = vector.shape_cast %94 : vector<8xf32> to vector<8x1xf32>
    %96 = vector.broadcast %95 : vector<8x1xf32> to vector<8x8xf32>
    %97 = arith.subf %93, %96 : vector<8x8xf32>
    %98 = math.exp %97 : vector<8x8xf32>
    %cst_42 = arith.constant dense<0.000000e+00> : vector<8xf32>
    %99 = vector.multi_reduction <add>, %98, %cst_42 [1] : vector<8x8xf32> to vector<8xf32>
    %100 = vector.shape_cast %99 : vector<8xf32> to vector<8x1xf32>
    %101 = vector.broadcast %100 : vector<8x1xf32> to vector<8x8xf32>
    %102 = arith.divf %98, %101 : vector<8x8xf32>
    %c0_43 = arith.constant 0 : index
    %c3 = arith.constant 3 : index
    %c0_44 = arith.constant 0 : index
    %c0_45 = arith.constant 0 : index
    %103 = vector.load %arg10[%c0_43, %c3, %c0_44, %c0_45] : memref<1x4x8x8xf32, #tpu.memory_space<vmem>>, vector<1x1x8x8xf32>
    %104 = vector.shape_cast %103 : vector<1x1x8x8xf32> to vector<8x8xf32>
    %105 = vector.shape_cast %102 : vector<8x8xf32> to vector<1x1x8x8xf32>
    tpu.vector_store %arg10[%c0_43, %c3, %c0_44, %c0_45], %105 {strides = array<i32>} : memref<1x4x8x8xf32, #tpu.memory_space<vmem>>, vector<1x1x8x8xf32>,
    %106 = arith.truncf %102 : vector<8x8xf32> to vector<8x8xbf16>
    %107 = vector.extract_strided_slice %16 {offsets = [0, 24], sizes = [8, 8], strides = [1, 1]} : vector<8x32xbf16> to vector<8x8xbf16>
    %cst_46 = arith.constant dense<0.000000e+00> : vector<8x8xf32>
    %108 = tpu.matmul %106, %107, %cst_46 {dimension_numbers = #tpu.dot_dimension_numbers<[1], [0], [0], [1], [0, 0, 1, 1], [], []>} : vector<8x8xbf16>, vector<8x8xbf16>, vector<8x8xf32> -> vector<8x8xf32>
    %109 = tpu.concatenate %39, %62, %85, %108 in 1 : vector<8x8xf32>, vector<8x8xf32>, vector<8x8xf32>, vector<8x8xf32> -> vector<8x32xf32>
    %110 = arith.truncf %109 : vector<8x32xf32> to vector<8x32xbf16>
    %c0_47 = arith.constant 0 : index
    %c0_48 = arith.constant 0 : index
    %111 = vector.load %arg5[%c0_47, %c0_48] : memref<32x32xbf16, #tpu.memory_space<vmem>>, vector<32x32xbf16>
    %cst_49 = arith.constant dense<0.000000e+00> : vector<8x32xf32>
    %112 = tpu.matmul %110, %111, %cst_49 {dimension_numbers = #tpu.dot_dimension_numbers<[1], [0], [0], [1], [0, 0, 1, 1], [], []>} : vector<8x32xbf16>, vector<32x32xbf16>, vector<8x32xf32> -> vector<8x32xf32>
    %c0_50 = arith.constant 0 : index
    %c0_51 = arith.constant 0 : index
    %113 = vector.load %arg6[%c0_50, %c0_51] : memref<1x32xf32, #tpu.memory_space<vmem>>, vector<1x32xf32>
    %114 = vector.broadcast %113 : vector<1x32xf32> to vector<8x32xf32>
    %115 = arith.addf %112, %114 : vector<8x32xf32>
    %116 = arith.addf %115, %1 : vector<8x32xf32>
    %c0_52 = arith.constant 0 : index
    %c0_53 = arith.constant 0 : index
    %117 = vector.load %arg7[%c0_52, %c0_53] : memref<1x32xf32, #tpu.memory_space<vmem>>, vector<1x32xf32>
    %c0_54 = arith.constant 0 : index
    %c0_55 = arith.constant 0 : index
    %118 = vector.load %arg8[%c0_54, %c0_55] : memref<1x32xf32, #tpu.memory_space<vmem>>, vector<1x32xf32>
    %cst_56 = arith.constant dense<0.000000e+00> : vector<8xf32>
    %119 = vector.multi_reduction <add>, %116, %cst_56 [1] : vector<8x32xf32> to vector<8xf32>
    %120 = vector.shape_cast %119 : vector<8xf32> to vector<8x1xf32>
    %cst_57 = arith.constant 3.200000e+01 : f32
    %121 = vector.broadcast %cst_57 : f32 to vector<8x1xf32>
    %122 = arith.divf %120, %121 : vector<8x1xf32>
    %123 = vector.broadcast %122 : vector<8x1xf32> to vector<8x32xf32>
    %124 = arith.subf %116, %123 : vector<8x32xf32>
    %125 = vector.broadcast %122 : vector<8x1xf32> to vector<8x32xf32>
    %126 = arith.subf %116, %125 : vector<8x32xf32>
    %127 = arith.mulf %124, %126 : vector<8x32xf32>
    %cst_58 = arith.constant dense<0.000000e+00> : vector<8xf32>
    %128 = vector.multi_reduction <add>, %127, %cst_58 [1] : vector<8x32xf32> to vector<8xf32>
    %129 = vector.shape_cast %128 : vector<8xf32> to vector<8x1xf32>
    %cst_59 = arith.constant 3.200000e+01 : f32
    %130 = vector.broadcast %cst_59 : f32 to vector<8x1xf32>
    %131 = arith.divf %129, %130 : vector<8x1xf32>
    %132 = vector.broadcast %122 : vector<8x1xf32> to vector<8x32xf32>
    %133 = arith.subf %116, %132 : vector<8x32xf32>
    %cst_60 = arith.constant 9.99999974E-6 : f32
    %134 = vector.broadcast %cst_60 : f32 to vector<8x1xf32>
    %135 = arith.addf %131, %134 : vector<8x1xf32>
    %136 = math.rsqrt %135 : vector<8x1xf32>
    %137 = vector.broadcast %136 : vector<8x1xf32> to vector<8x32xf32>
    %138 = arith.mulf %133, %137 : vector<8x32xf32>
    %139 = vector.broadcast %117 : vector<1x32xf32> to vector<8x32xf32>
    %140 = arith.mulf %138, %139 : vector<8x32xf32>
    %141 = vector.broadcast %118 : vector<1x32xf32> to vector<8x32xf32>
    %142 = arith.addf %140, %141 : vector<8x32xf32>
    %c0_61 = arith.constant 0 : index
    %c0_62 = arith.constant 0 : index
    %c0_63 = arith.constant 0 : index
    %143 = vector.load %arg9[%c0_61, %c0_62, %c0_63] : memref<1x8x32xf32, #tpu.memory_space<vmem>>, vector<1x8x32xf32>
    %144 = vector.shape_cast %143 : vector<1x8x32xf32> to vector<8x32xf32>
    %145 = vector.shape_cast %142 : vector<8x32xf32> to vector<1x8x32xf32>
    tpu.vector_store %arg9[%c0_61, %c0_62, %c0_63], %145 {strides = array<i32>} : memref<1x8x32xf32, #tpu.memory_space<vmem>>, vector<1x8x32xf32>,
    return
  }
  func.func @transform_0(%arg0: i32) -> (i32, i32, i32) {
    %c0_i32 = arith.constant 0 : i32
    %c0_i32_0 = arith.constant 0 : i32
    %c0_i32_1 = arith.constant 0 : i32
    return %arg0, %c0_i32, %c0_i32_0 : i32, i32, i32
  }
  func.func @transform_1(%arg0: i32) -> (i32, i32, i32) {
    %c0_i32 = arith.constant 0 : i32
    %c0_i32_0 = arith.constant 0 : i32
    %c0_i32_1 = arith.constant 0 : i32
    return %arg0, %c0_i32, %c0_i32_0 : i32, i32, i32
  }
  func.func @transform_2(%arg0: i32) -> (i32, i32) {
    %c0_i32 = arith.constant 0 : i32
    %c0_i32_0 = arith.constant 0 : i32
    %c0_i32_1 = arith.constant 0 : i32
    return %c0_i32, %c0_i32_0 : i32, i32
  }
  func.func @transform_3(%arg0: i32) -> (i32, i32) {
    %c0_i32 = arith.constant 0 : i32
    %c0_i32_0 = arith.constant 0 : i32
    %c0_i32_1 = arith.constant 0 : i32
    return %c0_i32, %c0_i32_0 : i32, i32
  }
  func.func @transform_4(%arg0: i32) -> (i32, i32) {
    %c0_i32 = arith.constant 0 : i32
    %c0_i32_0 = arith.constant 0 : i32
    %c0_i32_1 = arith.constant 0 : i32
    return %c0_i32, %c0_i32_0 : i32, i32
  }
  func.func @transform_5(%arg0: i32) -> (i32, i32) {
    %c0_i32 = arith.constant 0 : i32
    %c0_i32_0 = arith.constant 0 : i32
    %c0_i32_1 = arith.constant 0 : i32
    return %c0_i32, %c0_i32_0 : i32, i32
  }
  func.func @transform_6(%arg0: i32) -> (i32, i32) {
    %c0_i32 = arith.constant 0 : i32
    %c0_i32_0 = arith.constant 0 : i32
    %c0_i32_1 = arith.constant 0 : i32
    return %c0_i32, %c0_i32_0 : i32, i32
  }
  func.func @transform_7(%arg0: i32) -> (i32, i32) {
    %c0_i32 = arith.constant 0 : i32
    %c0_i32_0 = arith.constant 0 : i32
    %c0_i32_1 = arith.constant 0 : i32
    return %c0_i32, %c0_i32_0 : i32, i32
  }
  func.func @transform_8(%arg0: i32) -> (i32, i32, i32) {
    %c0_i32 = arith.constant 0 : i32
    %c0_i32_0 = arith.constant 0 : i32
    %c0_i32_1 = arith.constant 0 : i32
    return %arg0, %c0_i32, %c0_i32_0 : i32, i32, i32
  }
  func.func @transform_9(%arg0: i32) -> (i32, i32, i32, i32) {
    %c0_i32 = arith.constant 0 : i32
    %c0_i32_0 = arith.constant 0 : i32
    %c0_i32_1 = arith.constant 0 : i32
    %c0_i32_2 = arith.constant 0 : i32
    return %arg0, %c0_i32, %c0_i32_0, %c0_i32_1 : i32, i32, i32, i32
  }
}

</mosaic_0001>

<bundles_post_ra>
// kernel: tpu_custom_call.1
= control target key start
LH: loop header
LB: loop body
LE: loop exit
PB: predicated region body
PF: predicated region fallthrough
CT: control target
= control target key end

     0   :  { %s2149_s0 = inlined_call_operand.hbm [shape: f32[2,8,32], index: 0, kind: input, shape index: {}]   ;;  %s2150_s1 = inlined_call_operand.hbm [shape: f32[2,8,8], index: 1, kind: input, shape index: {}]   ;;  %s2151_s2 = inlined_call_operand.hbm [shape: bf16[32,96], index: 2, kind: input, shape index: {}]   ;;  %s2152_s3 = inlined_call_operand.vmem [shape: f32[1,96], index: 3, kind: input, shape index: {}]   ;;  %s2153_s4 = inlined_call_operand.hbm [shape: bf16[32,32], index: 4, kind: input, shape index: {}]   ;;  %s2154_s5 = inlined_call_operand.vmem [shape: f32[1,32], index: 5, kind: input, shape index: {}]   ;;  %s2155_s6 = inlined_call_operand.vmem [shape: f32[1,32], index: 6, kind: input, shape index: {}]   ;;  %s2156_s7 = inlined_call_operand.vmem [shape: f32[1,32], index: 7, kind: input, shape index: {}]   ;;  %s2157_s8 = inlined_call_operand.hbm [shape: f32[2,8,32], index: 8, kind: output, shape index: {0}]   ;;  %s2158_s9 = inlined_call_operand.hbm [shape: f32[2,4,8,8], index: 9, kind: output, shape index: {1}]  }
   0x1   :  { %2167 = sst [smem:[#allocation23_spill]] %s2151_s2 }
   0x2   :  { %2168 = sst [smem:[#allocation24_spill]] %s2153_s4 }
   0x3   :  { %15 = vsyncpa [#allocation3], 0 }
   0x4   :  { %17 = vsyncpa [#allocation3 + $0x1], 0 }
   0x5   :  { %18 = vsyncpa [#allocation6], 0 }
   0x6   :  { %20 = vsyncpa [#allocation6 + $0x1], 0 }
   0x7   :  { %21 = vsyncpa [#allocation9], 0 }
   0x8   :  { %22 = vsyncpa [#allocation4], 0 }
   0x9   :  { %24 = vsyncpa [#allocation4 + $0x1], 0 }
   0xa   :  { %25 = vsyncpa [#allocation12], 0 }
   0xb   :  { %27 = vsyncpa [#allocation12 + $0x1], 0  ;;  %s1788_s30 = smov 0   ;;  %s1790_s10 = smov 0  }
   0xc   :  { %s1792_s11 = smov 0   ;;  %s1794_s12 = smov 0  }
   0xd LB: > { %2169 = sst [smem:[#allocation19_spill]] %s1707_s11  ;;  %s1809_s13 = sadd.s32 4294967295, %s1711_s12   ;;  %s1711_s12 = sphi %s1794_s12, %s2192_s12   ;;  %s1707_s11 = sphi %s1792_s11, %s2194_s11   ;;  %s1703_s10 = sphi %s1790_s10, %s2196_s10   ;;  %s1699_s30 = sphi %s1788_s30, %s2195_s30  }
   0xe   : > { %s1248_s14 = sadd.s32 4294967294, %s1711_s12   ;;  %p53_p0 = scmp.ne.s32.totalorder %s1703_s10, %s1699_s30 }
   0xf   : > { %p2159_p1 = scmp.eq.s32.totalorder %s1809_s13, 0  ;;  %p235_p3 = scmp.eq.s32.totalorder %s1248_s14, 1 }
  0x10   : > { %p1249_p5 = scmp.ge.s32.totalorder %s1711_s12, 1  ;;  %p268_p7 = scmp.lt.s32.totalorder %s1711_s12, 3 }
  0x11   : > { %p1818_p4 = por %p2159_p1, %p53_p0  ;;  %p1823_p6 = por %p235_p3, %p53_p0 }
  0x12   : > { %p1828_p8 = pnand %p1249_p5, %p268_p7  ;;  %s1713_s18 = smov [#allocation7]  }
  0x13   : > { %s2170_s15 = scalar_select %p1818_p4, 1, 0 }
  0x14   : > { %s2171_s16 = scalar_select %p1823_p6, 1, 0 }
  0x15   : > { %s2173_s17 = scalar_select %p1828_p8, 1, 0 }
  0x16   : > { %2172 = sst [smem:[#allocation20_spill]] %s2171_s16  ;;  %s280_s19 = sshll.u32 %s1713_s18, 4  ;;  %s281_s19 = int_to_ptr.vmem [resolvable:$true] %s280_s19 }
  0x17   : > { %p1395_p9 = pneg %p1828_p8  ;;  %s1714_s21 = smov [#allocation8]  }
  0x18   : > { %s296_s22 = sshll.u32 %s1714_s21, 4  ;;  %s1508_s23 = scalar_lea.vmem %s281_s19, 256  ;;  %s297_s22 = int_to_ptr.vmem [resolvable:$true] %s296_s22 }
  0x19   : > { %p1837_p11 = pnand %p1395_p9, %p2159_p1  ;;  %p1509_p13 = scmp.ne.s32.totalorder %s281_s19, %s1508_s23 }
  0x1a   : > { %p1516_p5 = scmp.lt.s32.totalorder %s281_s19, %s281_s19  ;;  %p1517_p7 = scmp.lt.s32.totalorder %s1508_s23, %s1508_s23 }
  0x1b   : > { %p1499_p12 = pneg %p1837_p11 }
  0x1c   : > { %p1518_p10 = por %p1517_p7, %p1516_p5 }
  0x1d   : > { %p1511_p0 = pnand %p1509_p13, %p1499_p12 }
  0x1f   : > { %p1512_p3 = pneg %p1511_p0 }
  0x21   : > { %p1519_p9 = pnand %p1518_p10, %p1512_p3 }
  0x23   : > { %1522 = shalt.err (!%p1519_p9)
}
  0x24   : > { %s1715_s24 = smov 64   ;;  %s1716_s25 = smov 4  }
  0x25   : > { %s2175_s2 = sld [smem:[#allocation23_spill]]  ;;  %s1534_s28 = scalar_lea.vmem %s297_s22, 256 }
  0x26   : > { %p1535_p1 = scmp.ne.s32.totalorder %s297_s22, %s1534_s28  ;;  %p1542_p2 = scmp.lt.s32.totalorder %s297_s22, %s297_s22 }
  0x27   : > { %p1543_p6 = scmp.lt.s32.totalorder %s1534_s28, %s1534_s28 }
  0x28   : > { %p1537_p13 = pnand %p1535_p1, %p1499_p12 }
  0x29   : > { %p1544_p5 = por %p1543_p6, %p1542_p2 }
  0x2a   : > { %p1538_p0 = pneg %p1537_p13 }
  0x2b   : > { %1398 = dma.hbm_to_vmem [thread:$0]  (!%p1837_p11), %s2175_s2, 256, %s281_s19, [#allocation6], %s1715_s24, %s1715_s24, %s1716_s25  }
  0x2c   : > { %p1545_p10 = pnand %p1544_p5, %p1538_p0 }
  0x2e   : > { %1548 = shalt.err (!%p1545_p10)
}
  0x2f   : > { %s2176_s4 = sld [smem:[#allocation24_spill]]  ;;  %s1860_s18 = sadd.s32 1, %s1711_s12  }
  0x30   : > { %2177 = sst [smem:[#allocation21_spill]] %s1860_s18  ;;  %s40_s19 = sadd.s32 1, %s1707_s11 }
  0x31   : > { %s37_s20 = ssub.s32 %s1711_s12, %s1860_s18  ;;  %p47_p1 = scmp.ne.s32.totalorder %s1707_s11, %s1703_s10 }
  0x32   : > { %p38_p2 = scmp.eq.s32.totalorder %s37_s20, 0  ;;  %p48_p6 = scmp.eq.s32.totalorder %s1711_s12, 0 }
  0x33   : > { %p2178_p12 = scmp.eq.s32.totalorder %s1809_s13, 1  ;;  %p1418_p7 = scmp.lt.s32.totalorder %s1711_s12, 2 }
  0x34   : > { %s1876_s23 = scalar_select %p38_p2, %s1707_s11, %s40_s19  }
  0x35   : > { %1401 = dma.hbm_to_vmem [thread:$0]  (!%p1837_p11), %s2176_s4, 256, %s297_s22, [#allocation9], %s1715_s24, %s1715_s24, %s1716_s25  }
  0x36   : > { %p1870_p3 = por %p2178_p12, %p47_p1  ;;  %2180 = sst [smem:[#allocation22_spill]] %s1876_s23 }
  0x37   : > { %p49_p9 = por %p48_p6, %p47_p1  ;;  %s319_s26 = sand.u32 1, %s1707_s11  }
  0x38   : > { %s2179_s21 = scalar_select %p1870_p3, 1, 0 }
  0x39   : > { %s1879_s22 = sshll.u32 %s319_s26, 3  ;;  %s1254_s24 = sshll.u32 %s1711_s12, 7 }
  0x3a   : > { %s1885_s28 = scalar_lea.hbm %s2149_s0, %s1254_s24  ;;  %s323_s29 = scalar_lea.vmem [#allocation2], %s1879_s22 }
  0x3b   : > { %s330_s14 = sshll.u32 %s323_s29, 4  ;;  %p1890_p11 = pnand %p1418_p7, %p49_p9  ;;  %s1888_s14 = int_to_ptr.vmem [resolvable:$true] %s330_s14 }
  0x3c   : > { %s1897_s4 = scalar_lea.hbm %s2150_s1, %s1254_s24  ;;  %s337_s25 = sand.u32 1, %s1711_s12  }
  0x3d   : > { %s320_s27 = scalar_lea.sflag [#allocation3], %s319_s26  ;;  %s1549_s23 = scalar_lea.hbm %s1885_s28, 128 }
  0x3e   : > { %p1550_p13 = scmp.ne.s32.totalorder %s1885_s28, %s1549_s23  ;;  %p1551_p0 = pneg %p1890_p11 }
  0x3f   : > { %s1554_s18 = scalar_lea.hbm %s2149_s0, 256  ;;  %p1555_p1 = scmp.lt.s32.totalorder %s1885_s28, %s2149_s0 }
  0x40   : > { %p1552_p5 = pnand %p1551_p0, %p1550_p13  ;;  %p1556_p2 = scmp.lt.s32.totalorder %s1554_s18, %s1549_s23 }
  0x42   : > { %p1553_p10 = pneg %p1552_p5  ;;  %p1557_p6 = por %p1556_p2, %p1555_p1 }
  0x44   : > { %p1558_p12 = pnand %p1557_p6, %p1553_p10 }
  0x46   : > { %1561 = shalt.err (!%p1558_p12)
}
  0x47   : > { %s1562_s26 = scalar_lea.vmem %s1888_s14, 128  ;;  %s1717_s11 = smov [#allocation2]  }
  0x48   : > { %p1563_p7 = scmp.ne.s32.totalorder %s1888_s14, %s1562_s26  ;;  %s1567_s24 = sshll.u32 %s1717_s11, 4  ;;  %s1568_s24 = int_to_ptr.vmem [resolvable:$false] %s1567_s24 }
  0x49   : > { %s1569_s20 = scalar_lea.vmem %s1568_s24, 256  ;;  %p1570_p5 = scmp.lt.s32.totalorder %s1888_s14, %s1568_s24 }
  0x4a   : > { %p1565_p9 = pnand %p1563_p7, %p1551_p0  ;;  %p1571_p3 = scmp.lt.s32.totalorder %s1569_s20, %s1562_s26 }
  0x4c   : > { %p1566_p13 = pneg %p1565_p9  ;;  %p1572_p4 = por %p1571_p3, %p1570_p5 }
  0x4e   : > { %p1573_p1 = pnand %p1572_p4, %p1566_p13 }
  0x50   : > { %1576 = shalt.err (!%p1573_p1)
}
  0x51   : > { %1405 = dma.hbm_to_vmem [thread:$0]  (!%p1890_p11), %s1885_s28, 128, %s1888_s14, %s320_s27  }
  0x52   : > { %s341_s16 = scalar_lea.vmem [#allocation5], %s1879_s22  ;;  %s338_s23 = scalar_lea.sflag [#allocation6], %s337_s25 }
  0x53   : > { %s348_s18 = sshll.u32 %s341_s16, 4  ;;  %s1577_s29 = scalar_lea.hbm %s1897_s4, 128  ;;  %s349_s18 = int_to_ptr.vmem [resolvable:$true] %s348_s18 }
  0x54   : > { %p1578_p3 = scmp.ne.s32.totalorder %s1897_s4, %s1577_s29  ;;  %s1582_s11 = scalar_lea.hbm %s2150_s1, 256 }
  0x55   : > { %p1583_p2 = scmp.lt.s32.totalorder %s1897_s4, %s2150_s1  ;;  %p1584_p6 = scmp.lt.s32.totalorder %s1582_s11, %s1577_s29 }
  0x56   : > { %p1580_p4 = pnand %p1578_p3, %p1551_p0 }
  0x57   : > { %p1585_p12 = por %p1584_p6, %p1583_p2 }
  0x58   : > { %p1581_p10 = pneg %p1580_p4 }
  0x5a   : > { %p1586_p7 = pnand %p1585_p12, %p1581_p10 }
  0x5c   : > { %1589 = shalt.err (!%p1586_p7)
}
  0x5d   : > { %s1590_s22 = scalar_lea.vmem %s349_s18, 128  ;;  %s1718_s28 = smov [#allocation5]  }
  0x5e   : > { %p1591_p9 = scmp.ne.s32.totalorder %s349_s18, %s1590_s22  ;;  %s1595_s14 = sshll.u32 %s1718_s28, 4  ;;  %s1596_s14 = int_to_ptr.vmem [resolvable:$false] %s1595_s14 }
  0x5f   : > { %s1597_s25 = scalar_lea.vmem %s1596_s14, 256  ;;  %p1598_p1 = scmp.lt.s32.totalorder %s349_s18, %s1596_s14 }
  0x60   : > { %p1593_p13 = pnand %p1591_p9, %p1551_p0  ;;  %p1599_p3 = scmp.lt.s32.totalorder %s1597_s25, %s1590_s22 }
  0x62   : > { %p1594_p5 = pneg %p1593_p13  ;;  %p1600_p4 = por %p1599_p3, %p1598_p1 }
  0x64   : > { %p1601_p8 = pnand %p1600_p4, %p1594_p5 }
  0x66   : > { %1604 = shalt.err (!%p1601_p8)
}
  0x67   : > { %1408 = dma.hbm_to_vmem [thread:$0]  (!%p1890_p11), %s1897_s4, 128, %s349_s18, %s338_s23  }
  0x68   : > { %p2182_p10 = scmp.ne.s32.totalorder %s2173_s17, 0 }
  0x69   : > { %s1948_s27 = sand.u32 (!%p2182_p10), 1, %s1703_s10   ;;  %p2183_p0 = scmp.ne.s32.totalorder (!%p2182_p10), %s2170_s15, 0 }
  0x6a   : > { %357 = sbr.rel (%p2182_p10) target bundleno = 1849 (0x739), region = 52  ;;  %s1951_s16 = sshll.u32 (!%p2182_p10), %s1948_s27, 3 }
  0x6b   : > { %s360_s29 = scalar_lea.sflag (!%p2182_p10), [#allocation3], %s1948_s27  ;;  %s363_s2 = scalar_lea.vmem (!%p2182_p10), [#allocation2], %s1951_s16 }
  0x6f   : > { %1674 = dma.done.wait (%p2183_p0), %s360_s29, 128  }
  0x70   : > { %1676 = vsyncadd (%p2183_p0), %s360_s29, 4294967168  ;;  %s368_s4 = sand.u32 1, %s1809_s13   ;;  %s372_s19 = scalar_lea.vmem [#allocation5], %s1951_s16 }
  0x71   : > { %s369_s17 = scalar_lea.sflag [#allocation6], %s368_s4 }
  0x72   : > { %1678 = dma.done.wait (%p2183_p0), %s369_s17, 128  }
  0x73   : > { %1680 = vsyncadd (%p2183_p0), %s369_s17, 4294967168  ;;  %p2184_p8 = scmp.eq.s32.totalorder %s1809_s13, 0 }
  0x75   : > { %1682 = dma.done.wait (%p2184_p8), [#allocation6], 256   ;;  %p2185_p11 = pmov %p2184_p8 }
  0x76   : > { %p2186_p2 = pmov %p2184_p8 }
  0x77   : > { %1684 = vsyncadd (%p2185_p11), [#allocation6], 4294967040 }
  0x78   : > { %1686 = dma.done.wait (%p2186_p2), [#allocation9], 256   ;;  %p2187_p6 = pmov %p2186_p2 }
  0x79   : > { %v1719_v0 = vmov 0.0   ;;  %vm1720_vm0 = vmmov 0   ;;  %v1475_v1 = vld [vmem:[#allocation7 + $0x8] sm:$0xff]   ;;  %v1476_v2 = vld [vmem:[#allocation7] sm:$0xff]   ;;  %vm451_vm1 = vcmask 261120   ;;  %s1721_s23 = smov 96  }
  0x7a   : > { %1688 = vsyncadd (%p2187_p6), [#allocation9], 4294967040  ;;  %1315 = vmatprep.subr.bf16.mxu0 %v1719_v0  ;;  %1319 = vmatprep.mubr.msk.bf16.mxu0 %vm1720_vm0, %v1719_v0  ;;  %v1979_v3 = vld [vmem:[%s363_s2] sm:$0xff]  ;;  %s1722_s26 = smov 120   ;;  %s1723_s11 = smov 88   ;;  %vm503_vm2 = vcmask 64512  }
  0x7b   : > { %1323 = vmatprep.subr.bf16.mxu1 %v1719_v0  ;;  %1325 = vmatprep.mubr.msk.bf16.mxu1 %vm1720_vm0, %v1719_v0  ;;  %v427_v4 = vpack.c.bf16 %v1979_v3, %v1979_v3  ;;  %v1264_v5 = vld [vmem:[%s2152_s3] ss:$0 sm:$0xff]  ;;  %s1724_s24 = smov 80   ;;  %s1725_s20 = smov 112   ;;  %v495_v25 = vld [vmem:[%s372_s19] sm:$0xff]  ;;  %vm569_vm4 = vcmask 1043456  }
  0x7c   : > { %1316 = vmatpush3.bf16.msra.mxu0 %v1475_v1  ;;  %s1726_s22 = smov 72   ;;  %s1727_s28 = smov 104   ;;  %vm496_vm3 = vcmp.ne.f32.partialorder %v495_v25, 0.0  ;;  %vm966_vm5 = vcmask 130048   ;;  %vm968_vm6 = vcmask 195584  }
  0x7d   : > { %1317 = vmatprep.subr.bf16.mxu0 %v1719_v0  ;;  %s1728_s14 = smov 56   ;;  %s1729_s25 = smov 64  }
  0x7e   : > { %s1730_s29 = smov 40   ;;  %s1731_s2 = smov 48  }
  0x7f   : > { %s1263_s4 = sshll.u32 %s1948_s27, 5  ;;  %s1732_s19 = smov 8  }
  0x80   : > { %1318 = vmatpush3.bf16.msra.mxu0 %v1476_v2  ;;  %s2036_s17 = scalar_lea.vmem [#allocation11], %s1263_s4  ;;  %s1733_s15 = smov 16  }
  0x81   : > { %1329 = vmatprep.subr.bf16.mxu0 %v1719_v0  ;;  %s1734_s18 = smov 24   ;;  %p2188_p7 = scmp.ne.s32.totalorder %s2179_s21, 0 }
  0x83   : > { %1320 = vmatmul.mubr.msk.bf16.vlgmr.msra.gmra.mxu0 %vm451_vm1, %v427_v4 }
  0x84   : > { %1331 = vmatprep.mubr.msk.bf16.mxu0 %vm1720_vm0, %v1719_v0 }
 0x143   : > { %v489_v6 = vpop.f32.mrf.mxu0 }
 0x144   : > { %v490_v7 = vadd.f32 %v1264_v5, %v489_v6 }
 0x145   : > { %v1321_v8 = vpop.f32.mrf.mxu0 }
 0x146   : > { %v1991_v9 = vpack.c.bf16 %v490_v7, %v490_v7  ;;  %v498_v10 = vmul.f32 0.35355338, %v490_v7 }
 0x147   : > { %v492_v11 = vpop.f32.mrf.mxu0 }
 0x148   : > { %v499_v12 = vpack.c.bf16 %v498_v10, %v498_v10  ;;  %501 = vrot.lane.b32.xlu0 %v1991_v9, %s1721_s23 }
 0x149   : > { %v1322_v13 = vpop.f32.mrf.mxu0 }
 0x14a   : > { %614 = vrot.lane.b32.xlu1 %v499_v12, %s1722_s26 }
 0x14c   : > { %616 = vrot.lane.b32.xlu0 %v1991_v9, %s1723_s11  ;;  %s1292_s11 = sshll.u32 %s1809_s13, 9 }
 0x14e   : > { %729 = vrot.lane.b32.xlu1 %v1991_v9, %s1724_s24  ;;  %s1101_s24 = sshll.u32 %s2036_s17, 4  ;;  %s2080_s24 = int_to_ptr.vmem [resolvable:$true] %s1101_s24 }
 0x150   : > { %727 = vrot.lane.b32.xlu0 %v499_v12, %s1725_s20 }
 0x152   : > { %842 = vrot.lane.b32.xlu1 %v1991_v9, %s1726_s22 }
 0x154   : > { %840 = vrot.lane.b32.xlu0 %v499_v12, %s1727_s28  ;;  %s2078_s28 = scalar_lea.hbm %s2158_s9, %s1292_s11 }
 0x1ba   : > { %v502_v14 = vpop.permute.xlu0 %501 }
 0x1bb   : > { %v508_v15 = vsel %vm503_vm2, %v502_v14, 0 }
 0x1bc   : > { %1324 = vmatpush3.bf16.xpose.msra.mxu1 %v508_v15  ;;  %v615_v17 = vpop.permute.xlu1 %614 }
 0x1bd   : > { %1335 = vmatprep.subr.bf16.mxu1 %v1719_v0 }
 0x1be   : > { %v617_v16 = vpop.permute.xlu0 %616 }
 0x1bf   : > { %v622_v18 = vsel %vm503_vm2, %v617_v16, 0 }
 0x1c0   : > { %v730_v19 = vpop.permute.xlu1 %729 }
 0x1c1   : > { %v735_v20 = vsel %vm503_vm2, %v730_v19, 0 }
 0x1c2   : > { %v728_v22 = vpop.permute.xlu0 %727 }
 0x1c3   : > { %1326 = vmatmul.mubr.msk.bf16.vlgmr.msra.gmra.mxu1 %vm503_vm2, %v499_v12 }
 0x1c4   : > { %1336 = vmatpush3.bf16.xpose.msra.mxu1 %v622_v18  ;;  %1337 = vmatprep.mubr.msk.bf16.mxu1 %vm1720_vm0, %v1719_v0  ;;  %v843_v21 = vpop.permute.xlu1 %842 }
 0x1c5   : > { %1347 = vmatprep.subr.bf16.mxu1 %v1719_v0  ;;  %v848_v23 = vsel %vm503_vm2, %v843_v21, 0 }
 0x1c6   : > { %v841_v24 = vpop.permute.xlu0 %840 }
 0x1cb   : > { %1338 = vmatmul.mubr.msk.bf16.vlgmr.msra.gmra.mxu1 %vm503_vm2, %v615_v17 }
 0x1cc   : > { %1348 = vmatpush3.bf16.xpose.msra.mxu1 %v735_v20  ;;  %1349 = vmatprep.mubr.msk.bf16.mxu1 %vm1720_vm0, %v1719_v0 }
 0x1cd   : > { %1359 = vmatprep.subr.bf16.mxu1 %v1719_v0 }
 0x1d3   : > { %1350 = vmatmul.mubr.msk.bf16.vlgmr.msra.gmra.mxu1 %vm503_vm2, %v728_v22 }
 0x1d4   : > { %1360 = vmatpush3.bf16.xpose.msra.mxu1 %v848_v23  ;;  %1361 = vmatprep.mubr.msk.bf16.mxu1 %vm1720_vm0, %v1719_v0 }
 0x1d5   : > { %1371 = vmatprep.subr.bf16.mxu1 %v1719_v0 }
 0x1db   : > { %1362 = vmatmul.mubr.msk.bf16.vlgmr.msra.gmra.mxu1 %vm503_vm2, %v841_v24 }
 0x1dc   : > { %1375 = vmatprep.mubr.msk.bf16.mxu1 %vm1720_vm0, %v1719_v0 }
 0x283   : > { %v544_v26 = vpop.f32.mrf.mxu1 }
 0x284   : > { %v550_v27 = vsel %vm496_vm3, %v544_v26, -inf }
 0x285   : > { %v1327_v28 = vpop.f32.mrf.mxu1  ;;  %v551_v29 = vsel %vm503_vm2, %v550_v27, -inf }
 0x286   : > { %552 = vmax.xlane.f32.xlu1 %v551_v29 }
 0x287   : > { %v547_v30 = vpop.f32.mrf.mxu1 }
 0x289   : > { %v1328_v31 = vpop.f32.mrf.mxu1 }
 0x28b   : > { %v658_v32 = vpop.f32.mrf.mxu1 }
 0x28c   : > { %v664_v33 = vsel %vm496_vm3, %v658_v32, -inf }
 0x28d   : > { %v1339_v34 = vpop.f32.mrf.mxu1  ;;  %v665_v35 = vsel %vm503_vm2, %v664_v33, -inf }
 0x28e   : > { %666 = vmax.xlane.f32.xlu0 %v665_v35 }
 0x28f   : > { %v661_v36 = vpop.f32.mrf.mxu1 }
 0x291   : > { %v1340_v37 = vpop.f32.mrf.mxu1 }
 0x293   : > { %v771_v38 = vpop.f32.mrf.mxu1 }
 0x294   : > { %v777_v39 = vsel %vm496_vm3, %v771_v38, -inf }
 0x295   : > { %v1351_v40 = vpop.f32.mrf.mxu1  ;;  %v778_v41 = vsel %vm503_vm2, %v777_v39, -inf }
 0x296   : > { %779 = vmax.xlane.f32.xlu0 %v778_v41  ;;  %v1477_v40 = vld [vmem:[#allocation8 + $0x8] sm:$0xff]   ;;  %v1478_v41 = vld [vmem:[#allocation8] sm:$0xff]  }
 0x297   : > { %v774_v42 = vpop.f32.mrf.mxu1  ;;  %1372 = vmatpush3.bf16.msra.mxu1 %v1477_v40 }
 0x298   : > { %1373 = vmatprep.subr.bf16.mxu1 %v1719_v0 }
 0x299   : > { %v1352_v43 = vpop.f32.mrf.mxu1 }
 0x29b   : > { %v884_v44 = vpop.f32.mrf.mxu1  ;;  %1374 = vmatpush3.bf16.msra.mxu1 %v1478_v41 }
 0x29c   : > { %v890_v45 = vsel %vm496_vm3, %v884_v44, -inf }
 0x29d   : > { %v1363_v46 = vpop.f32.mrf.mxu1  ;;  %v891_v47 = vsel %vm503_vm2, %v890_v45, -inf }
 0x29e   : > { %892 = vmax.xlane.f32.xlu1 %v891_v47 }
 0x29f   : > { %v887_v48 = vpop.f32.mrf.mxu1 }
 0x2a1   : > { %v1364_v49 = vpop.f32.mrf.mxu1 }
 0x30f   : > { %v553_v50 = vpop.xlane.xlu1 %552 }
 0x310   : > { %v554_v51 = vsub.f32 %v550_v27, %v553_v50 }
 0x312   : > { %v555_v52 = vmul.f32 1.442695, %v554_v51 }
 0x314   : > { %1479 = vpow2.f32 %v555_v52 }
 0x317   : > { %v667_v53 = vpop.xlane.xlu0 %666 }
 0x318   : > { %v668_v54 = vsub.f32 %v664_v33, %v667_v53 }
 0x31a   : > { %v669_v55 = vmul.f32 1.442695, %v668_v54 }
 0x31c   : > { %1481 = vpow2.f32 %v669_v55 }
 0x31f   : > { %v780_v56 = vpop.xlane.xlu0 %779 }
 0x320   : > { %v781_v57 = vsub.f32 %v777_v39, %v780_v56  ;;  %v1279_v56 = vld [vmem:[%s2154_s5] ss:$0 sm:$0xff] }
 0x321   : > { %v1480_v58 = vpop.eup %1479 }
 0x322   : > { %v782_v59 = vmul.f32 1.442695, %v781_v57  ;;  %v557_v60 = vsel %vm503_vm2, %v1480_v58, 0.0 }
 0x323   : > { %558 = vadd.xlane.f32.xlu0 %v557_v60 }
 0x324   : > { %1483 = vpow2.f32 %v782_v59 }
 0x327   : > { %v893_v2 = vpop.xlane.xlu1 %892 }
 0x328   : > { %v894_v4 = vsub.f32 %v890_v45, %v893_v2 }
 0x329   : > { %v1482_v61 = vpop.eup %1481 }
 0x32a   : > { %v671_v62 = vsel %vm503_vm2, %v1482_v61, 0.0  ;;  %v895_v5 = vmul.f32 1.442695, %v894_v4 }
 0x32b   : > { %672 = vadd.xlane.f32.xlu1 %v671_v62 }
 0x32c   : > { %1485 = vpow2.f32 %v895_v5 }
 0x331   : > { %v1484_v63 = vpop.eup %1483 }
 0x332   : > { %v784_v1 = vsel %vm503_vm2, %v1484_v63, 0.0 }
 0x333   : > { %785 = vadd.xlane.f32.xlu0 %v784_v1 }
 0x339   : > { %v1486_v6 = vpop.eup %1485 }
 0x33a   : > { %v897_v7 = vsel %vm503_vm2, %v1486_v6, 0.0 }
 0x33c   : > { %679 = vrot.lane.b32.xlu1 %v1991_v9, %s1728_s14  ;;  %s1075_s14 = scalar_lea.sflag [#allocation12], %s1948_s27 }
 0x349   : > { %564 = vrot.lane.b32.xlu0 %v1991_v9, %s1729_s25  ;;  %s1605_s25 = scalar_lea.vmem %s2080_s24, 512 }
 0x34a   : > { %p1606_p12 = scmp.ne.s32.totalorder %s2080_s24, %s1605_s25 }
 0x34c   : > { %p1607_p9 = pnand %p1606_p12, %p2188_p7 }
 0x34d   : > { %905 = vrot.lane.b32.xlu0 %v1991_v9, %s1730_s29  ;;  %s1735_s29 = smov [#allocation11]  }
 0x34e   : > { %p1608_p13 = pneg %p1607_p9 }
 0x360   : > { %898 = vadd.xlane.f32.xlu1 %v897_v7 }
 0x371   : > { %792 = vrot.lane.b32.xlu1 %v1991_v9, %s1731_s2  ;;  %s1609_s2 = sshll.u32 %s1735_s29, 4  ;;  %s1610_s2 = int_to_ptr.vmem [resolvable:$false] %s1609_s2 }
 0x372   : > { %s1611_s4 = scalar_lea.vmem %s1610_s2, 1024  ;;  %p1612_p5 = scmp.lt.s32.totalorder %s2080_s24, %s1610_s2 }
 0x373   : > { %p1613_p1 = scmp.lt.s32.totalorder %s1611_s4, %s1605_s25 }
 0x375   : > { %p1614_p3 = por %p1613_p1, %p1612_p5 }
 0x377   : > { %p1615_p4 = pnand %p1614_p3, %p1608_p13 }
 0x3ac   : > { %v559_v8 = vpop.xlane.xlu0 %558 }
 0x3ad   : > { %1487 = vrcp.f32 %v559_v8 }
 0x3b4   : > { %v673_v10 = vpop.xlane.xlu1 %672 }
 0x3b5   : > { %1489 = vrcp.f32 %v673_v10 }
 0x3b8   : > { %v680_v16 = vpop.permute.xlu1 %679 }
 0x3b9   : > { %v685_v19 = vsel %vm569_vm4, %v680_v16, 0 }
 0x3ba   : > { %v1488_v11 = vpop.eup %1487 }
 0x3bb   : > { %v561_v12 = vmul.f32 %v1488_v11, %v1480_v58 }
 0x3bc   : > { %v786_v13 = vpop.xlane.xlu0 %785 }
 0x3bd   : > { %1491 = vrcp.f32 %v786_v13  ;;  %562 = vst.msk [vmem:[%s2036_s17] sm:$0xff] %vm503_vm2, %v561_v12  ;;  %v563_v17 = vpack.c.bf16 %v561_v12, %v561_v12 }
 0x3c0   : > { %v565_v14 = vpop.permute.xlu0 %564 }
 0x3c1   : > { %v571_v15 = vsel %vm569_vm4, %v565_v14, 0 }
 0x3c2   : > { %v1490_v9 = vpop.eup %1489  ;;  %1330 = vmatpush3.bf16.msra.mxu0 %v571_v15 }
 0x3c3   : > { %1341 = vmatprep.subr.bf16.mxu0 %v1719_v0  ;;  %v675_v18 = vmul.f32 %v1490_v9, %v1482_v61 }
 0x3c4   : > { %v906_v26 = vpop.permute.xlu0 %905 }
 0x3c5   : > { %1332 = vmatmul.mubr.msk.bf16.vlgmr.msra.gmra.mxu0 %vm503_vm2, %v563_v17  ;;  %1271 = vst.msk [vmem:[%s2036_s17 + $0x8] sm:$0xff] %vm503_vm2, %v675_v18  ;;  %v678_v21 = vpack.c.bf16 %v675_v18, %v675_v18  ;;  %v911_v28 = vsel %vm569_vm4, %v906_v26, 0 }
 0x3c6   : > { %1342 = vmatpush3.bf16.msra.mxu0 %v685_v19  ;;  %1343 = vmatprep.mubr.msk.bf16.mxu0 %vm1720_vm0, %v1719_v0 }
 0x3c7   : > { %1353 = vmatprep.subr.bf16.mxu0 %v1719_v0 }
 0x3ca   : > { %v1492_v20 = vpop.eup %1491 }
 0x3cb   : > { %v788_v22 = vmul.f32 %v1492_v20, %v1484_v63 }
 0x3cd   : > { %1344 = vmatmul.mubr.msk.bf16.vlgmr.msra.gmra.mxu0 %vm503_vm2, %v678_v21  ;;  %1274 = vst.msk [vmem:[%s2036_s17 + $0x10] sm:$0xff] %vm503_vm2, %v788_v22  ;;  %v791_v27 = vpack.c.bf16 %v788_v22, %v788_v22 }
 0x3ce   : > { %1355 = vmatprep.mubr.msk.bf16.mxu0 %vm1720_vm0, %v1719_v0 }
 0x3e9   : > { %v899_v23 = vpop.xlane.xlu1 %898 }
 0x3ea   : > { %1493 = vrcp.f32 %v899_v23 }
 0x3ed   : > { %v793_v24 = vpop.permute.xlu1 %792 }
 0x3ee   : > { %v798_v25 = vsel %vm569_vm4, %v793_v24, 0 }
 0x3ef   : > { %1354 = vmatpush3.bf16.msra.mxu0 %v798_v25 }
 0x3f0   : > { %1365 = vmatprep.subr.bf16.mxu0 %v1719_v0 }
 0x3f2   : > { %1356 = vmatmul.mubr.msk.bf16.vlgmr.msra.gmra.mxu0 %vm503_vm2, %v791_v27 }
 0x3f3   : > { %1366 = vmatpush3.bf16.msra.mxu0 %v911_v28  ;;  %1367 = vmatprep.mubr.msk.bf16.mxu0 %vm1720_vm0, %v1719_v0 }
 0x3f7   : > { %v1494_v29 = vpop.eup %1493 }
 0x3f8   : > { %v901_v30 = vmul.f32 %v1494_v29, %v1486_v6 }
 0x3fa   : > { %1277 = vst.msk [vmem:[%s2036_s17 + $0x18] sm:$0xff] %vm503_vm2, %v901_v30  ;;  %v904_v31 = vpack.c.bf16 %v901_v30, %v901_v30 }
 0x3fc   : > { %1368 = vmatmul.mubr.msk.bf16.vlgmr.msra.gmra.mxu0 %vm503_vm2, %v904_v31 }
 0x485   : > { %v607_v32 = vpop.f32.mrf.mxu0 }
 0x487   : > { %v1333_v33 = vpop.f32.mrf.mxu0 }
 0x489   : > { %v610_v34 = vpop.f32.mrf.mxu0 }
 0x48b   : > { %v1334_v35 = vpop.f32.mrf.mxu0 }
 0x48d   : > { %v721_v36 = vpop.f32.mrf.mxu0 }
 0x48e   : > { %954 = vrot.lane.b32.xlu1 %v721_v36, %s1732_s19 }
 0x48f   : > { %v1345_v37 = vpop.f32.mrf.mxu0 }
 0x491   : > { %v724_v38 = vpop.f32.mrf.mxu0 }
 0x493   : > { %v1346_v39 = vpop.f32.mrf.mxu0 }
 0x4b2   : > { %v834_v42 = vpop.f32.mrf.mxu0 }
 0x4b3   : > { %958 = vrot.lane.b32.xlu0 %v834_v42, %s1733_s15 }
 0x4b4   : > { %v1357_v43 = vpop.f32.mrf.mxu0 }
 0x4b6   : > { %v837_v44 = vpop.f32.mrf.mxu0 }
 0x4b8   : > { %v1358_v45 = vpop.f32.mrf.mxu0 }
 0x4bc   : > { %v947_v46 = vpop.f32.mrf.mxu0 }
 0x4bd   : > { %962 = vrot.lane.b32.xlu1 %v947_v46, %s1734_s18 }
 0x4be   : > { %v1369_v47 = vpop.f32.mrf.mxu0 }
 0x4c0   : > { %v950_v48 = vpop.f32.mrf.mxu0 }
 0x4c2   : > { %v1370_v49 = vpop.f32.mrf.mxu0 }
 0x500   : > { %v955_v50 = vpop.permute.xlu1 %954 }
 0x501   : > { %v965_v0 = vsel %vm503_vm2, %v607_v32, %v955_v50 }
 0x525   : > { %v959_v51 = vpop.permute.xlu0 %958 }
 0x526   : > { %v967_v52 = vsel %vm966_vm5, %v965_v0, %v959_v51 }
 0x52f   : > { %v963_v53 = vpop.permute.xlu1 %962 }
 0x530   : > { %v969_v54 = vsel %vm968_vm6, %v967_v52, %v963_v53 }
 0x531   : > { %v970_v55 = vpack.c.bf16 %v969_v54, %v969_v54 }
 0x533   : > { %1376 = vmatmul.mubr.msk.bf16.vlgmr.msra.gmra.mxu1 %vm451_vm1, %v970_v55 }
 0x5f3   : > { %v1031_v57 = vpop.f32.mrf.mxu1 }
 0x5f4   : > { %v1032_v58 = vadd.f32 %v1279_v56, %v1031_v57 }
 0x5f5   : > { %v1377_v59 = vpop.f32.mrf.mxu1 }
 0x5f6   : > { %v1037_v60 = vadd.f32 %v1032_v58, %v1979_v3 }
 0x5f7   : > { %v1034_v61 = vpop.f32.mrf.mxu1 }
 0x5f8   : > { %v1040_v62 = vsel %vm451_vm1, %v1037_v60, 0.0 }
 0x5f9   : > { %1041 = vadd.xlane.f32.xlu0 %v1040_v62  ;;  %v1378_v63 = vpop.f32.mrf.mxu1 }
 0x682   : > { %v1042_v1 = vpop.xlane.xlu0 %1041 }
 0x683   : > { %v1044_v2 = vmul.f32 0.03125, %v1042_v1 }
 0x685   : > { %v1045_v4 = vsub.f32 %v1037_v60, %v1044_v2 }
 0x687   : > { %v1046_v5 = vmul.f32 %v1045_v4, %v1045_v4 }
 0x689   : > { %v1047_v6 = vsel %vm451_vm1, %v1046_v5, 0.0 }
 0x68a   : > { %1048 = vadd.xlane.f32.xlu1 %v1047_v6 }
 0x68b   : > { %1618 = shalt.err (!%p1615_p4)
}
 0x68c   : > { %s1619_s17 = scalar_lea.hbm %s2078_s28, 512  ;;  %s1623_s23 = scalar_lea.hbm %s2158_s9, 1024 }
 0x68d   : > { %p1620_p10 = scmp.ne.s32.totalorder %s2078_s28, %s1619_s17  ;;  %p1624_p11 = scmp.lt.s32.totalorder %s2078_s28, %s2158_s9 }
 0x68e   : > { %p1625_p2 = scmp.lt.s32.totalorder %s1623_s23, %s1619_s17 }
 0x68f   : > { %p1621_p0 = pnand %p1620_p10, %p2188_p7 }
 0x690   : > { %p1626_p6 = por %p1625_p2, %p1624_p11 }
 0x691   : > { %p1622_p8 = pneg %p1621_p0 }
 0x693   : > { %p1627_p12 = pnand %p1626_p6, %p1622_p8 }
 0x695   : > { %1630 = shalt.err (!%p1627_p12)
}
 0x696   : > { %s1736_s20 = smov 128   ;;  %v1283_v11 = vld [vmem:[%s2155_s6] ss:$0 sm:$0xff]  ;;  %s1287_s4 = sshll.u32 %s1809_s13, 7 }
 0x697   : > { %1392 = dma.vmem_to_hbm [thread:$0]  (%p2188_p7), %s2080_s24, 512, %s2078_s28, %s1075_s14, %s1736_s20, %s1736_s20, %s1732_s19  }
 0x698   : > { %v1284_v13 = vld [vmem:[%s2156_s7] ss:$0 sm:$0xff]  ;;  %s417_s17 = scalar_lea.vmem [#allocation10], %s1951_s16  ;;  %s1086_s28 = scalar_lea.hbm %s2157_s8, %s1287_s4 }
 0x699   : > { %s1088_s15 = sshll.u32 %s417_s17, 4  ;;  %s1070_s14 = scalar_lea.sflag [#allocation4], %s1948_s27  ;;  %s1089_s15 = int_to_ptr.vmem [resolvable:$true] %s1088_s15 }
 0x69a   : > { %s1631_s18 = scalar_lea.vmem %s1089_s15, 128  ;;  %s1737_s23 = smov [#allocation10]  }
 0x69b   : > { %p1632_p9 = scmp.ne.s32.totalorder %s1089_s15, %s1631_s18  ;;  %s1635_s26 = sshll.u32 %s1737_s23, 4  ;;  %s1636_s26 = int_to_ptr.vmem [resolvable:$false] %s1635_s26 }
 0x69c   : > { %s1637_s13 = scalar_lea.vmem %s1636_s26, 256  ;;  %p1638_p1 = scmp.lt.s32.totalorder %s1089_s15, %s1636_s26 }
 0x69d   : > { %p1633_p13 = pnand %p1632_p9, %p2188_p7  ;;  %p1639_p3 = scmp.lt.s32.totalorder %s1637_s13, %s1631_s18 }
 0x69f   : > { %p1634_p5 = pneg %p1633_p13  ;;  %p1640_p4 = por %p1639_p3, %p1638_p1 }
 0x6a1   : > { %p1641_p10 = pnand %p1640_p4, %p1634_p5 }
 0x713   : > { %v1049_v3 = vpop.xlane.xlu1 %1048 }
 0x714   : > { %v1050_v7 = vmul.f32 0.03125, %v1049_v3 }
 0x716   : > { %v1051_v8 = vadd.f32 1e-05, %v1050_v7 }
 0x718   : > { %1495 = vrsqrt.f32 %v1051_v8 }
 0x725   : > { %v1496_v10 = vpop.eup %1495 }
 0x726   : > { %v1053_v12 = vmul.f32 %v1496_v10, %v1045_v4 }
 0x728   : > { %v1060_v14 = vmul.f32 %v1283_v11, %v1053_v12 }
 0x72a   : > { %v1067_v15 = vadd.f32 %v1284_v13, %v1060_v14 }
 0x72c   : > { %1068 = vst.msk [vmem:[%s417_s17] sm:$0xff] %vm451_vm1, %v1067_v15 }
 0x72d   : > { %1644 = shalt.err (!%p1641_p10)
}
 0x72e   : > { %s1645_s16 = scalar_lea.hbm %s1086_s28, 128  ;;  %s1649_s20 = scalar_lea.hbm %s2157_s8, 256 }
 0x72f   : > { %p1646_p0 = scmp.ne.s32.totalorder %s1086_s28, %s1645_s16  ;;  %p1650_p2 = scmp.lt.s32.totalorder %s1086_s28, %s2157_s8 }
 0x730   : > { %p1651_p6 = scmp.lt.s32.totalorder %s1649_s20, %s1645_s16 }
 0x731   : > { %p1647_p8 = pnand %p1646_p0, %p2188_p7 }
 0x732   : > { %p1652_p12 = por %p1651_p6, %p1650_p2 }
 0x733   : > { %p1648_p11 = pneg %p1647_p8 }
 0x735   : > { %p1653_p9 = pnand %p1652_p12, %p1648_p11 }
 0x737   : > { %1656 = shalt.err (!%p1653_p9)
}
 0x738   : > { %1391 = dma.vmem_to_hbm [thread:$0]  (%p2188_p7), %s1089_s15, 128, %s1086_s28, %s1070_s14  }
 0x739 PF: > { %s2189_s29 = sld [smem:[#allocation20_spill]]  ;;  %s1116_s2 = sand.u32 1, %s1699_s30  }
 0x73a   : > { %p2191_p5 = scmp.ge.s32.totalorder %s1711_s12, 2  ;;  %s1117_s4 = scalar_lea.sflag [#allocation4], %s1116_s2 }
 0x73f   : > { %p2190_p13 = scmp.ne.s32.totalorder %s2189_s29, 0 }
 0x741   : > { %p1410_p1 = pnand %p2191_p5, %p2190_p13 }
 0x743   : > { %p1411_p3 = pneg %p1410_p1 }
 0x745   : > { %1690 = dma.done.wait (%p1411_p3), %s1117_s4, 128  }
 0x746   : > { %1692 = vsyncadd (%p1411_p3), %s1117_s4, 4294967168  ;;  %s1126_s17 = scalar_lea.sflag [#allocation12], %s1116_s2 }
 0x747   : > { %1694 = dma.done.wait (%p1411_p3), %s1126_s17, 512  }
 0x748   : > { %1696 = vsyncadd (%p1411_p3), %s1126_s17, 4294966784  ;;  %s2192_s12 = sld [smem:[#allocation21_spill]]  ;;  %s2195_s30 = smov %s1703_s10 }
 0x749   : > { %s2193_s19 = sld [smem:[#allocation19_spill]] }
 0x74a   : > { %s2194_s11 = sld [smem:[#allocation22_spill]] }
 0x74e   : > { %p30_p7 = scmp.ge.s32.totalorder %s2192_s12, 4  }
 0x74f   : > { %s2196_s10 = smov %s2193_s19 }
 0x750   :  { %32 = sbr.rel (!%p30_p7) target bundleno = 13 (0xd), region = 138 }
 0x755   :  { %1131 = vsyncpa [#allocation3], 1 }
 0x756   :  { %1133 = vsyncpa [#allocation3 + $0x1], 1 }
 0x757   :  { %1134 = vsyncpa [#allocation6], 1 }
 0x758   :  { %1136 = vsyncpa [#allocation6 + $0x1], 1 }
 0x759   :  { %1137 = vsyncpa [#allocation9], 1 }
 0x75a   :  { %1138 = vsyncpa [#allocation4], 1 }
 0x75b   :  { %1140 = vsyncpa [#allocation4 + $0x1], 1 }
 0x75c   :  { %1141 = vsyncpa [#allocation12], 1 }
 0x75d   :  { %1143 = vsyncpa [#allocation12 + $0x1], 1 }

</bundles_post_ra>
